<compile_context>
chip_gen: v7x
topology: tpu7x:2x2x1
jax: 0.10.0
libtpu: 0.0.40
codegen_flags: <defaults>
</compile_context>

<pallas_src>
import functools

import jax
import jax.numpy as jnp
from jax import lax
from jax.experimental import pallas as pl
from jax.experimental.pallas import tpu as pltpu

EPS = 1e-5                      # nn.LayerNorm default eps
K = 7                           # conv kernel size
PAD = 3                         # conv padding
HALO = 8                        # sublane-aligned halo block rows (>= PAD)
MM_DTYPE = jnp.bfloat16         # MXU operand dtype (accumulation stays f32)
_SQRT_2_OVER_PI = 0.7978845608028654
_GELU_C = 0.044715
_INV_SQRT2 = 0.7071067811865476


# ----------------------------- kernel helpers -------------------------------

def _layernorm(x, gamma, beta):
    mu = jnp.mean(x, axis=-1, keepdims=True)
    xc = x - mu
    var = jnp.mean(xc * xc, axis=-1, keepdims=True)
    return xc * lax.rsqrt(var + EPS) * gamma + beta


def _gelu_tanh(x):
    # tanh-approx GELU: the transcendental goes to the EUP (separate bundle
    # slot) instead of erf's long f32 VPU polynomial on the serial chain.
    # ~1e-3 abs deviation from PyTorch's exact-erf F.gelu.
    return 0.5 * x * (1.0 + jnp.tanh(_SQRT_2_OVER_PI * (x + _GELU_C * x * x * x)))


def _gelu_exact(x):
    # PyTorch F.gelu default (exact erf formulation).
    return 0.5 * x * (1.0 + lax.erf(x * _INV_SQRT2))


# -------------------------------- kernels ------------------------------------

def _in_conv_norm_kernel(xi_ref, w_ref, b_ref, g_ref, beta_ref, o_ref):
    # xi_ref: (tile_t, 7*Cin) im2col block;  w_ref: (7*Cin, C) bf16.
    y = jnp.dot(xi_ref[...].astype(MM_DTYPE), w_ref[...],
                preferred_element_type=jnp.float32) + b_ref[...]
    o_ref[...] = _layernorm(y, g_ref[...], beta_ref[...])


def _convnext_layer_kernel(xc_ref, xl_ref, xr_ref, dw_w_ref, dw_b_ref,
                           g_ref, beta_ref, w1_ref, b1_ref, w2_ref, b2_ref,
                           scale_ref, o_ref, *, tile_t, use_tanh_gelu):
    t = pl.program_id(1)
    nt = pl.num_programs(1)
    center = xc_ref[...]                                        # (tile_t, C) f32
    # Neighbour 8-row blocks supply the conv halo; zero them at sequence edges
    # (reproduces the conv's zero padding without any HBM pad round trip).
    left = xl_ref[...] * (t > 0).astype(jnp.float32)            # (8, C)
    right = xr_ref[...] * (t < nt - 1).astype(jnp.float32)      # (8, C)
    dw_w = dw_w_ref[...]                                        # (7, C)
    dw_b = dw_b_ref[...]                                        # (1, C)

    if tile_t >= 2 * HALO:
        # Interior rows (8 .. tile_t-9): 7 taps as XLU rolls of the center
        # tile only (no padded-tile concat, no extra halo rows in the rolls).
        acc = dw_b + center * dw_w[PAD:PAD + 1, :]              # tap k = 3
        for k in range(K):
            if k == PAD:
                continue
            s = k - PAD                                         # -3..3, != 0
            rolled = pltpu.roll(center, shift=(-s) % tile_t, axis=0)
            acc = acc + rolled * dw_w[k:k + 1, :]
        # First / last 8 rows: exact recompute from small 24-row halo windows.
        top_win = jnp.concatenate([left, center[:2 * HALO, :]], axis=0)
        bot_win = jnp.concatenate([center[tile_t - 2 * HALO:, :], right], axis=0)
        n_win = 3 * HALO
        top = dw_b
        bot = dw_b
        for k in range(K):
            # rolled[i] = win[i + (HALO + k - PAD)]  for i in [0, 8)
            shift = (n_win - (HALO + k - PAD)) % n_win
            wk = dw_w[k:k + 1, :]
            top = top + pltpu.roll(top_win, shift=shift, axis=0)[:HALO, :] * wk
            bot = bot + pltpu.roll(bot_win, shift=shift, axis=0)[:HALO, :] * wk
        if tile_t == 2 * HALO:
            dw = jnp.concatenate([top, bot], axis=0)
        else:
            dw = jnp.concatenate([top, acc[HALO:tile_t - HALO, :], bot], axis=0)
    else:
        # Tiny-tile fallback (tile_t == 8): old padded-tile path.
        xp = jnp.concatenate([left, center, right], axis=0)     # (tile_t+16, C)
        n_rows = tile_t + 2 * HALO
        dw = dw_b
        for k in range(K):
            shifted = pltpu.roll(xp, shift=n_rows - (HALO - PAD + k), axis=0)
            dw = dw + shifted[:tile_t, :] * dw_w[k:k + 1, :]

    y = _layernorm(dw, g_ref[...], beta_ref[...])
    h = jnp.dot(y.astype(MM_DTYPE), w1_ref[...],
                preferred_element_type=jnp.float32) + b1_ref[...]
    h = _gelu_tanh(h) if use_tanh_gelu else _gelu_exact(h)
    z = jnp.dot(h.astype(MM_DTYPE), w2_ref[...],
                preferred_element_type=jnp.float32) + b2_ref[...]
    o_ref[...] = center + scale_ref[...] * z                    # residual


def _head_kernel(x_ref, g_ref, beta_ref, w_ref, b_ref, o_ref):
    # Folded head: LayerNorm -> single (tile_t, C) x (C, hop) matmul -> clip.
    y = _layernorm(x_ref[...], g_ref[...], beta_ref[...])
    o = jnp.dot(y.astype(MM_DTYPE), w_ref[...],
                preferred_element_type=jnp.float32) + b_ref[...]
    # TODO(synk): for hop_length < 128 (masked vst on v5e) emit a flattened
    # lane-dense output block; realistic hops (>=128) are already lane-dense
    # and the final (B,1,T*hop) reshape outside is metadata-only.
    o_ref[...] = jnp.clip(o, -1.0, 1.0)


# ----------------------------- pallas wrappers -------------------------------

@functools.lru_cache(maxsize=None)
def _device_budget():
    """(max_tile_t, vmem_limit_bytes) per chip generation."""
    try:
        vmem_cap = getattr(pltpu.get_tpu_info(), "vmem_capacity_bytes", None)
    except Exception:
        vmem_cap = None
    mib = 1024 * 1024
    if vmem_cap is None:
        return 512, 48 * mib            # unknown: conservative (safe on v7x)
    if vmem_cap <= 80 * mib:
        return 512, 48 * mib            # v7x-class: 64 MiB VMEM per TC
    return 1024, 64 * mib               # v5e / v6e: 128 MiB physical VMEM


def _compiler_params(vmem_limit):
    return pltpu.CompilerParams(
        dimension_semantics=("parallel", "parallel"),
        vmem_limit_bytes=vmem_limit)


def _const_spec(shape):
    nd = len(shape)
    return pl.BlockSpec(shape, lambda b, t, nd=nd: (0,) * nd)


def _bt_spec(tile_t, c):
    return pl.BlockSpec((None, tile_t, c), lambda b, t: (b, t, 0))


def _choose_tile_t(T, max_tile, batch):
    """Largest multiple-of-8 divisor of T <= max_tile, hard-capped fallback."""
    def largest_divisor(cap):
        cap = min(cap, T)
        cap -= cap % 8
        for cand in range(cap, 7, -8):
            if T % cand == 0:
                return cand
        return None

    tile = largest_divisor(max_tile)
    if tile is None:
        # Awkward T (e.g. 8*prime): hard-cap instead of a whole-sequence tile
        # that could blow the VMEM budget.
        # TODO(synk): pl.cdiv grid + edge-masked partial last tile.
        tile = largest_divisor(4 * max_tile) or 8
    # Keep >= 2 total grid steps so both v7x TensorCores get work (megacore).
    if batch * (T // tile) < 2 and tile >= 32:
        half = largest_divisor(tile // 2)
        if half is not None:
            tile = half
    return tile


def in_conv_norm(xi, w2col, b, g, beta, tile_t, vmem_limit):
    B, T, KCin = xi.shape
    C = w2col.shape[1]
    return pl.pallas_call(
        _in_conv_norm_kernel,
        out_shape=jax.ShapeDtypeStruct((B, T, C), jnp.float32),
        grid=(B, T // tile_t),
        in_specs=[_bt_spec(tile_t, KCin),
                  _const_spec(w2col.shape), _const_spec(b.shape),
                  _const_spec(g.shape), _const_spec(beta.shape)],
        out_specs=_bt_spec(tile_t, C),
        compiler_params=_compiler_params(vmem_limit),
    )(xi, w2col, b, g, beta)


def convnext_layer(x, L, tile_t, vmem_limit, use_tanh_gelu):
    B, T, C = x.shape
    rb = tile_t // 8                     # halo-block index stride (8-row units)
    last8 = max(T // 8 - 1, 0)
    center_spec = _bt_spec(tile_t, C)
    left_spec = pl.BlockSpec(
        (None, HALO, C), lambda b, t: (b, jnp.maximum(t * rb - 1, 0), 0))
    right_spec = pl.BlockSpec(
        (None, HALO, C), lambda b, t: (b, jnp.minimum((t + 1) * rb, last8), 0))
    params = (L["dw_w"], L["dw_b"], L["g"], L["b"],
              L["w1"], L["b1"], L["w2"], L["b2"], L["scale"])
    return pl.pallas_call(
        functools.partial(_convnext_layer_kernel, tile_t=tile_t,
                          use_tanh_gelu=use_tanh_gelu),
        out_shape=jax.ShapeDtypeStruct((B, T, C), jnp.float32),
        grid=(B, T // tile_t),
        in_specs=[center_spec, left_spec, right_spec]
                 + [_const_spec(p.shape) for p in params],
        out_specs=center_spec,
        compiler_params=_compiler_params(vmem_limit),
    )(x, x, x, *params)


def head(x, g, beta, w_head, b_head, tile_t, vmem_limit):
    B, T, C = x.shape
    hop = w_head.shape[1]
    return pl.pallas_call(
        _head_kernel,
        out_shape=jax.ShapeDtypeStruct((B, T, hop), jnp.float32),
        grid=(B, T // tile_t),
        in_specs=[_bt_spec(tile_t, C),
                  _const_spec(g.shape), _const_spec(beta.shape),
                  _const_spec(w_head.shape), _const_spec(b_head.shape)],
        out_specs=_bt_spec(tile_t, hop),
        compiler_params=_compiler_params(vmem_limit),
    )(x, g, beta, w_head, b_head)


def wavenext_forward(x_ncl, kp, *, max_tile_t=None, use_tanh_gelu=True):
    """x_ncl: (B, in_channel, T), exactly like the PyTorch module input."""
    x = jnp.transpose(x_ncl, (0, 2, 1)).astype(jnp.float32)     # (B, T, Cin)
    B, T, Cin = x.shape
    if T % 8 != 0:
        # TODO(synk): support T % 8 != 0 (needs an edge-masked partial tile).
        raise ValueError("wavenext_forward requires T to be a multiple of 8")
    budget_tile, vmem_limit = _device_budget()
    if max_tile_t is None:
        max_tile_t = budget_tile
    tile_t = _choose_tile_t(T, max_tile_t, B)

    # Input conv as one matmul: im2col built once on the (small) network input.
    xp = jnp.pad(x, ((0, 0), (PAD, PAD), (0, 0)))
    xi = jnp.concatenate([xp[:, k:k + T, :] for k in range(K)], axis=-1)

    y = in_conv_norm(xi, kp["in_conv_w2col"], kp["in_conv_b"],
                     kp["norm_g"], kp["norm_b"], tile_t, vmem_limit)
    for L in kp["layers"]:
        y = convnext_layer(y, L, tile_t, vmem_limit, use_tanh_gelu)
    o = head(y, kp["norm_last_g"], kp["norm_last_b"],
             kp["head_w"], kp["head_b"], tile_t, vmem_limit)
    B, T, hop = o.shape
    return o.reshape(B, 1, T * hop)


# ------------------------- deterministic parameters --------------------------

def init_params(key, in_channel, channel, h_channel, n_fft, hop_length, num_layers):
    """Float32 parameters (same semantics as the PyTorch module)."""
    s = 0.1
    ks = jax.random.split(key, 3 + num_layers)
    f32 = jnp.float32
    p = {
        # PyTorch Conv1d weight (C, Cin, 7) rearranged to (7, Cin, C)
        "in_conv_w": (jax.random.normal(ks[0], (K, in_channel, channel)) * s).astype(f32),
        "in_conv_b": jnp.zeros((1, channel), f32),
        "norm_g": jnp.ones((1, channel), f32), "norm_b": jnp.zeros((1, channel), f32),
        "norm_last_g": jnp.ones((1, channel), f32), "norm_last_b": jnp.zeros((1, channel), f32),
        "out_w": (jax.random.normal(ks[1], (channel, n_fft)) * s).astype(f32),
        "out_b": jnp.zeros((1, n_fft), f32),
        "fc_w": (jax.random.normal(ks[2], (n_fft, hop_length)) * s).astype(f32),
    }
    scale = 1.0 / num_layers
    layers = []
    for i in range(num_layers):
        k0, k1, k2 = jax.random.split(ks[3 + i], 3)
        layers.append({
            # depthwise Conv1d weight (C, 1, 7) rearranged to (7, C)
            "dw_w": (jax.random.normal(k0, (K, channel)) * s).astype(f32),
            "dw_b": jnp.zeros((1, channel), f32),
            "g": jnp.ones((1, channel), f32), "b": jnp.zeros((1, channel), f32),
            "w1": (jax.random.normal(k1, (channel, h_channel)) * s).astype(f32),
            "b1": jnp.zeros((1, h_channel), f32),
            "w2": (jax.random.normal(k2, (h_channel, channel)) * s).astype(f32),
            "b2": jnp.zeros((1, channel), f32),
            "scale": jnp.full((1, channel), scale, f32),
        })
    p["layers"] = layers
    return p


def prepare_params(p, mm_dtype=MM_DTYPE):
    """Kernel-ready params: matmul weights pre-cast to bf16, input-conv weight
    pre-reshaped to (7*Cin, C), head linears folded into one (C, hop) matmul."""
    head_w = jnp.dot(p["out_w"], p["fc_w"])       # folded in f32 (exact)
    head_b = jnp.dot(p["out_b"], p["fc_w"])
    return {
        "in_conv_w2col": p["in_conv_w"].reshape(-1, p["in_conv_w"].shape[-1]).astype(mm_dtype),
        "in_conv_b": p["in_conv_b"],
        "norm_g": p["norm_g"], "norm_b": p["norm_b"],
        "norm_last_g": p["norm_last_g"], "norm_last_b": p["norm_last_b"],
        "head_w": head_w.astype(mm_dtype), "head_b": head_b,
        "layers": [dict(L, w1=L["w1"].astype(mm_dtype), w2=L["w2"].astype(mm_dtype))
                   for L in p["layers"]],
    }


# --------------------------- pure-JAX reference ------------------------------

def wavenext_ref(x_ncl, p, *, mm_dtype=jnp.float32, use_tanh_gelu=False,
                 fold_head=False):
    """Pure-JAX reference.  With mm_dtype=bf16, use_tanh_gelu=True and
    fold_head=True it mimics the kernel's arithmetic exactly; the defaults
    reproduce the original PyTorch module semantics."""
    def mm(a, b):
        return jnp.dot(a.astype(mm_dtype), b.astype(mm_dtype),
                       preferred_element_type=jnp.float32)

    gelu = _gelu_tanh if use_tanh_gelu else _gelu_exact
    x = jnp.transpose(x_ncl, (0, 2, 1)).astype(jnp.float32)
    T = x.shape[1]
    xp = jnp.pad(x, ((0, 0), (PAD, PAD), (0, 0)))
    y = sum(mm(xp[:, k:k + T], p["in_conv_w"][k]) for k in range(K)) + p["in_conv_b"]
    y = _layernorm(y, p["norm_g"], p["norm_b"])
    for L in p["layers"]:
        yp = jnp.pad(y, ((0, 0), (PAD, PAD), (0, 0)))
        dw = sum(yp[:, k:k + T] * L["dw_w"][k] for k in range(K)) + L["dw_b"]
        h = _layernorm(dw, L["g"], L["b"])
        h = mm(h, L["w1"]) + L["b1"]
        h = gelu(h)
        h = mm(h, L["w2"]) + L["b2"]
        y = y + L["scale"] * h
    z = _layernorm(y, p["norm_last_g"], p["norm_last_b"])
    if fold_head:
        o = mm(z, jnp.dot(p["out_w"], p["fc_w"])) + jnp.dot(p["out_b"], p["fc_w"])
    else:
        o = mm(mm(z, p["out_w"]) + p["out_b"], p["fc_w"])
    return jnp.clip(o, -1.0, 1.0).reshape(o.shape[0], 1, -1)


# ----------------------------------- main -------------------------------------

if __name__ == "__main__":
    def run_case(name, B, T, in_channel, channel, h_channel, n_fft, hop_length,
                 num_layers, max_tile_t):
        key = jax.random.PRNGKey(0)
        kx, kparam = jax.random.split(key)
        x = jax.random.normal(kx, (B, in_channel, T), jnp.float32)   # NCL input
        params = init_params(kparam, in_channel, channel, h_channel,
                             n_fft, hop_length, num_layers)
        kparams = prepare_params(params)

        out = jax.block_until_ready(
            wavenext_forward(x, kparams, max_tile_t=max_tile_t))
        assert out.shape == (B, 1, T * hop_length), (name, out.shape)
        assert bool(jnp.all(jnp.isfinite(out))), name

        # Tight check vs a reference with matching bf16 MXU operands, folded
        # head and tanh GELU (isolates tiling / halo / kernel-math correctness).
        ref_m = wavenext_ref(x, params, mm_dtype=MM_DTYPE,
                             use_tanh_gelu=True, fold_head=True)
        err_m = float(jnp.max(jnp.abs(out - ref_m)))
        assert err_m < 2e-3, (name, err_m)

        # Loose check vs the original module semantics (f32, exact-erf GELU,
        # two head matmuls); only bf16 rounding + GELU approximation differ.
        ref_f = wavenext_ref(x, params)
        err_f = float(jnp.max(jnp.abs(out - ref_f)))
        assert err_f < 5e-2, (name, err_f)

    # Multi-tile grid with tile_t=16: exercises the rolled-center depthwise
    # path, the 24-row halo windows and both sequence-edge masks.
    run_case("multi_tile", B=2, T=32, in_channel=8, channel=32, h_channel=64,
             n_fft=16, hop_length=4, num_layers=2, max_tile_t=16)
    # Tiny tiles (tile_t=8): exercises the small-tile fallback depthwise path.
    run_case("tiny_tile", B=1, T=16, in_channel=8, channel=32, h_channel=64,
             n_fft=16, hop_length=4, num_layers=2, max_tile_t=8)

    print("KERNEL_OK")
</pallas_src>

<mosaic_0001>
module attributes {stable_mosaic.version = 11 : i64} {
  func.func @_in_conv_norm_kernel(%arg0: i32, %arg1: i32, %arg2: memref<1x16x56xf32, #tpu.memory_space<vmem>>, %arg3: memref<56x32xbf16, #tpu.memory_space<vmem>>, %arg4: memref<1x32xf32, #tpu.memory_space<vmem>>, %arg5: memref<1x32xf32, #tpu.memory_space<vmem>>, %arg6: memref<1x32xf32, #tpu.memory_space<vmem>>, %arg7: memref<1x16x32xf32, #tpu.memory_space<vmem>>) attributes {dimension_semantics = [#tpu.dimension_semantics<parallel>, #tpu.dimension_semantics<parallel>], iteration_bounds = array<i64: 2, 2>, scalar_prefetch = 0 : i64, scratch_operands = 0 : i64, tpu.core_type = #tpu.core_type<tc>, window_params = [{transform_indices = @transform_0, window_bounds = array<i64: 1, 16, 56>}, {pipeline_mode = #tpu.pipeline_mode<synchronous>, transform_indices = @transform_1, window_bounds = array<i64: 56, 32>}, {pipeline_mode = #tpu.pipeline_mode<synchronous>, transform_indices = @transform_2, window_bounds = array<i64: 1, 32>}, {pipeline_mode = #tpu.pipeline_mode<synchronous>, transform_indices = @transform_3, window_bounds = array<i64: 1, 32>}, {pipeline_mode = #tpu.pipeline_mode<synchronous>, transform_indices = @transform_4, window_bounds = array<i64: 1, 32>}, {transform_indices = @transform_5, window_bounds = array<i64: 1, 16, 32>}]} {
    %c0 = arith.constant 0 : index
    %c0_0 = arith.constant 0 : index
    %c0_1 = arith.constant 0 : index
    %0 = vector.load %arg2[%c0, %c0_0, %c0_1] : memref<1x16x56xf32, #tpu.memory_space<vmem>>, vector<1x16x56xf32>
    %1 = vector.shape_cast %0 : vector<1x16x56xf32> to vector<16x56xf32>
    %2 = arith.truncf %1 : vector<16x56xf32> to vector<16x56xbf16>
    %c0_2 = arith.constant 0 : index
    %c0_3 = arith.constant 0 : index
    %3 = vector.load %arg3[%c0_2, %c0_3] : memref<56x32xbf16, #tpu.memory_space<vmem>>, vector<56x32xbf16>
    %cst = arith.constant dense<0.000000e+00> : vector<16x32xf32>
    %4 = tpu.matmul %2, %3, %cst {dimension_numbers = #tpu.dot_dimension_numbers<[1], [0], [0], [1], [0, 0, 1, 1], [], []>} : vector<16x56xbf16>, vector<56x32xbf16>, vector<16x32xf32> -> vector<16x32xf32>
    %c0_4 = arith.constant 0 : index
    %c0_5 = arith.constant 0 : index
    %5 = vector.load %arg4[%c0_4, %c0_5] : memref<1x32xf32, #tpu.memory_space<vmem>>, vector<1x32xf32>
    %6 = vector.broadcast %5 : vector<1x32xf32> to vector<16x32xf32>
    %7 = arith.addf %4, %6 : vector<16x32xf32>
    %c0_6 = arith.constant 0 : index
    %c0_7 = arith.constant 0 : index
    %8 = vector.load %arg5[%c0_6, %c0_7] : memref<1x32xf32, #tpu.memory_space<vmem>>, vector<1x32xf32>
    %c0_8 = arith.constant 0 : index
    %c0_9 = arith.constant 0 : index
    %9 = vector.load %arg6[%c0_8, %c0_9] : memref<1x32xf32, #tpu.memory_space<vmem>>, vector<1x32xf32>
    %cst_10 = arith.constant dense<0.000000e+00> : vector<16xf32>
    %10 = vector.multi_reduction <add>, %7, %cst_10 [1] : vector<16x32xf32> to vector<16xf32>
    %11 = vector.shape_cast %10 : vector<16xf32> to vector<16x1xf32>
    %cst_11 = arith.constant 3.200000e+01 : f32
    %12 = vector.broadcast %cst_11 : f32 to vector<16x1xf32>
    %13 = arith.divf %11, %12 : vector<16x1xf32>
    %14 = vector.broadcast %13 : vector<16x1xf32> to vector<16x32xf32>
    %15 = arith.subf %7, %14 : vector<16x32xf32>
    %16 = arith.mulf %15, %15 : vector<16x32xf32>
    %cst_12 = arith.constant dense<0.000000e+00> : vector<16xf32>
    %17 = vector.multi_reduction <add>, %16, %cst_12 [1] : vector<16x32xf32> to vector<16xf32>
    %18 = vector.shape_cast %17 : vector<16xf32> to vector<16x1xf32>
    %cst_13 = arith.constant 3.200000e+01 : f32
    %19 = vector.broadcast %cst_13 : f32 to vector<16x1xf32>
    %20 = arith.divf %18, %19 : vector<16x1xf32>
    %cst_14 = arith.constant 9.99999974E-6 : f32
    %21 = vector.broadcast %cst_14 : f32 to vector<16x1xf32>
    %22 = arith.addf %20, %21 : vector<16x1xf32>
    %23 = math.rsqrt %22 : vector<16x1xf32>
    %24 = vector.broadcast %23 : vector<16x1xf32> to vector<16x32xf32>
    %25 = arith.mulf %15, %24 : vector<16x32xf32>
    %26 = vector.broadcast %8 : vector<1x32xf32> to vector<16x32xf32>
    %27 = arith.mulf %25, %26 : vector<16x32xf32>
    %28 = vector.broadcast %9 : vector<1x32xf32> to vector<16x32xf32>
    %29 = arith.addf %27, %28 : vector<16x32xf32>
    %c0_15 = arith.constant 0 : index
    %c0_16 = arith.constant 0 : index
    %c0_17 = arith.constant 0 : index
    %30 = vector.load %arg7[%c0_15, %c0_16, %c0_17] : memref<1x16x32xf32, #tpu.memory_space<vmem>>, vector<1x16x32xf32>
    %31 = vector.shape_cast %30 : vector<1x16x32xf32> to vector<16x32xf32>
    %32 = vector.shape_cast %29 : vector<16x32xf32> to vector<1x16x32xf32>
    tpu.vector_store %arg7[%c0_15, %c0_16, %c0_17], %32 {strides = array<i32>} : memref<1x16x32xf32, #tpu.memory_space<vmem>>, vector<1x16x32xf32>,
    return
  }
  func.func @transform_0(%arg0: i32, %arg1: i32) -> (i32, i32, i32) {
    %c0_i32 = arith.constant 0 : i32
    %c0_i32_0 = arith.constant 0 : i32
    return %arg0, %arg1, %c0_i32 : i32, i32, i32
  }
  func.func @transform_1(%arg0: i32, %arg1: i32) -> (i32, i32) {
    %c0_i32 = arith.constant 0 : i32
    %c0_i32_0 = arith.constant 0 : i32
    %c0_i32_1 = arith.constant 0 : i32
    return %c0_i32, %c0_i32_0 : i32, i32
  }
  func.func @transform_2(%arg0: i32, %arg1: i32) -> (i32, i32) {
    %c0_i32 = arith.constant 0 : i32
    %c0_i32_0 = arith.constant 0 : i32
    %c0_i32_1 = arith.constant 0 : i32
    return %c0_i32, %c0_i32_0 : i32, i32
  }
  func.func @transform_3(%arg0: i32, %arg1: i32) -> (i32, i32) {
    %c0_i32 = arith.constant 0 : i32
    %c0_i32_0 = arith.constant 0 : i32
    %c0_i32_1 = arith.constant 0 : i32
    return %c0_i32, %c0_i32_0 : i32, i32
  }
  func.func @transform_4(%arg0: i32, %arg1: i32) -> (i32, i32) {
    %c0_i32 = arith.constant 0 : i32
    %c0_i32_0 = arith.constant 0 : i32
    %c0_i32_1 = arith.constant 0 : i32
    return %c0_i32, %c0_i32_0 : i32, i32
  }
  func.func @transform_5(%arg0: i32, %arg1: i32) -> (i32, i32, i32) {
    %c0_i32 = arith.constant 0 : i32
    %c0_i32_0 = arith.constant 0 : i32
    return %arg0, %arg1, %c0_i32 : i32, i32, i32
  }
}

</mosaic_0001>

<bundles_post_ra>
// kernel: tpu_custom_call.1
= control target key start
LH: loop header
LB: loop body
LE: loop exit
PB: predicated region body
PF: predicated region fallthrough
CT: control target
= control target key end

     0   :  { %10 = vsyncpa [#allocation3], 0  ;;  %s1033_s0 = inlined_call_operand.hbm [shape: f32[2,32,56], index: 0, kind: input, shape index: {}]   ;;  %s1034_s1 = inlined_call_operand.vmem [shape: bf16[56,32], index: 1, kind: input, shape index: {}]   ;;  %s1035_s2 = inlined_call_operand.vmem [shape: f32[1,32], index: 2, kind: input, shape index: {}]   ;;  %s1036_s3 = inlined_call_operand.vmem [shape: f32[1,32], index: 3, kind: input, shape index: {}]   ;;  %s1037_s4 = inlined_call_operand.vmem [shape: f32[1,32], index: 4, kind: input, shape index: {}]   ;;  %s1038_s5 = inlined_call_operand.hbm [shape: f32[2,32,32], index: 5, kind: output, shape index: {}]  }
   0x1   :  { %12 = vsyncpa [#allocation3 + $0x1], 0 }
   0x2   :  { %13 = vsyncpa [#allocation4], 0 }
   0x3   :  { %15 = vsyncpa [#allocation4 + $0x1], 0  ;;  %s807_s18 = smov 0   ;;  %s809_s19 = smov 0  }
   0x4   :  { %s811_s20 = smov 0   ;;  %s813_s21 = smov 0  }
   0x5   :  { %s815_s22 = smov 0   ;;  %s817_s23 = smov 0  }
   0x6   :  { %s819_s24 = smov 0   ;;  %s821_s25 = smov 0  }
   0x7 LB: > { %1043 = sst [smem:[#allocation8_spill]] %s739_s18  ;;  %s505_s26 = sadd.s32 4294967295, %s767_s25   ;;  %s767_s25 = sphi %s821_s25, %s21_s25   ;;  %s763_s24 = sphi %s819_s24, %s1062_s24   ;;  %s759_s23 = sphi %s817_s23, %s1061_s23   ;;  %s755_s22 = sphi %s815_s22, %s1060_s22   ;;  %s751_s21 = sphi %s813_s21, %s1059_s21   ;;  %s747_s20 = sphi %s811_s20, %s1058_s20   ;;  %s743_s19 = sphi %s809_s19, %s1057_s19   ;;  %s739_s18 = sphi %s807_s18, %s1056_s18  }
   0x8   : > { %s506_s27 = sadd.s32 4294967294, %s767_s25   ;;  %s30_s28 = sadd.s32 1, %s759_s23 }
   0x9   : > { %s33_s29 = sadd.s32 1, %s763_s24  ;;  %p31_p0 = scmp.ge.s32.totalorder %s30_s28, 2 }
   0xa   : > { %s42_s30 = sadd.s32 1, %s747_s20  ;;  %p49_p1 = scmp.ne.s32.totalorder %s747_s20, %s743_s19 }
   0xb   : > { %p50_p2 = scmp.eq.s32.totalorder %s767_s25, 0  ;;  %s1064_s28 = smov (%p31_p0, %s30_s28), 0 }
   0xc   : > { %1044 = sst [smem:[#allocation9_spill]] %s1064_s28  ;;  %s1066_s29 = smov (!%p31_p0, %s33_s29), %s763_s24 }
   0xd   : > { %s38_s6 = ssub.s32 %s759_s23, %s1064_s28  ;;  %p860_p3 = por %p50_p2, %p49_p1 }
   0xe   : > { %p35_p4 = scmp.ge.s32.totalorder %s1066_s29, 2  ;;  %p55_p5 = scmp.ne.s32.totalorder %s743_s19, %s739_s18 }
   0xf   : > { %p56_p6 = scmp.eq.s32.totalorder %s505_s26, 0  ;;  %p165_p7 = scmp.eq.s32.totalorder %s505_s26, 3 }
  0x10   : > { %s1068_s29 = smov (%p35_p4, %s1066_s29), 0  ;;  %p171_p10 = scmp.eq.s32.totalorder %s506_s27, 3 }
  0x11   : > { %1046 = sst [smem:[#allocation10_spill]] %s1068_s29  ;;  %p868_p8 = por %p56_p6, %p55_p5 }
  0x12   : > { %p872_p9 = por %p165_p7, %p49_p1  ;;  %s37_s10 = ssub.s32 %s763_s24, %s1068_s29 }
  0x13   : > { %s39_s11 = sor.u32 %s38_s6, %s37_s10  ;;  %p878_p12 = por %p171_p10, %p55_p5 }
  0x14   : > { %s1048_s9 = scalar_select %p872_p9, 1, 0 }
  0x15   : > { %p40_p11 = scmp.eq.s32.totalorder %s39_s11, 0  ;;  %p559_p13 = scmp.lt.s32.totalorder %s767_s25, 4 }
  0x16   : > { %s1049_s12 = scalar_select %p878_p12, 1, 0 }
  0x17   : > { %s203_s13 = sand.u32 1, %s747_s20   ;;  %s510_s16 = sshll.u32 %s759_s23, 1 }
  0x18   : > { %s885_s14 = scalar_select %p40_p11, %s747_s20, %s42_s30  }
  0x19   : > { %s509_s15 = sshll.u32 %s203_s13, 4  ;;  %s511_s17 = sshll.u32 %s763_s24, 2 }
  0x1a   : > { %s207_s26 = scalar_lea.vmem [#allocation2], %s509_s15  ;;  %s213_s18 = sadd.s32 %s511_s17, %s510_s16 }
  0x1b   : > { %s216_s28 = sshll.u32 %s207_s26, 4  ;;  %s512_s29 = sshll.u32 %s213_s18, 7  ;;  %s889_s28 = int_to_ptr.vmem [resolvable:$true] %s216_s28 }
  0x1c   : > { %p893_p0 = pnand %p559_p13, %p860_p3  ;;  %s900_s30 = scalar_lea.hbm %s1033_s0, %s512_s29 }
  0x1d   : > { %s902_s11 = scalar_lea.sflag [#allocation3], %s203_s13  ;;  %s639_s15 = scalar_lea.hbm %s900_s30, 256 }
  0x1e   : > { %p640_p1 = scmp.ne.s32.totalorder %s900_s30, %s639_s15  ;;  %p641_p2 = pneg %p893_p0 }
  0x1f   : > { %s644_s16 = scalar_lea.hbm %s1033_s0, 1024  ;;  %p645_p5 = scmp.lt.u32.totalorder %s900_s30, %s1033_s0 }
  0x20   : > { %p642_p3 = pnand %p641_p2, %p640_p1  ;;  %p646_p6 = scmp.lt.u32.totalorder %s644_s16, %s639_s15 }
  0x21   : > { %p648_p10 = scmp.lt.u32.totalorder %s639_s15, %s900_s30 }
  0x22   : > { %p643_p4 = pneg %p642_p3  ;;  %p647_p7 = por %p646_p6, %p645_p5 }
  0x24   : > { %p649_p11 = por %p648_p10, %p647_p7 }
  0x26   : > { %p650_p13 = pnand %p649_p11, %p643_p4 }
  0x28   : > { %653 = shalt.err (!%p650_p13)
}
  0x29   : > { %s654_s13 = scalar_lea.vmem %s889_s28, 256  ;;  %s769_s26 = smov [#allocation2]  }
  0x2a   : > { %p655_p1 = scmp.ne.s32.totalorder %s889_s28, %s654_s13  ;;  %s659_s6 = sshll.u32 %s769_s26, 4  ;;  %s660_s6 = int_to_ptr.vmem [resolvable:$false] %s659_s6 }
  0x2b   : > { %s661_s10 = scalar_lea.vmem %s660_s6, 512  ;;  %p662_p9 = scmp.lt.s32.totalorder %s889_s28, %s660_s6 }
  0x2c   : > { %p657_p3 = pnand %p655_p1, %p641_p2  ;;  %p663_p5 = scmp.lt.s32.totalorder %s661_s10, %s654_s13 }
  0x2e   : > { %p658_p12 = pneg %p657_p3  ;;  %p664_p6 = por %p663_p5, %p662_p9 }
  0x30   : > { %p665_p7 = pnand %p664_p6, %p658_p12 }
  0x32   : > { %668 = shalt.err (!%p665_p7)
}
  0x33   : > { %s770_s15 = smov 128   ;;  %s771_s18 = smov 8  }
  0x34   : > { %554 = dma.hbm_to_vmem [thread:$0]  (!%p893_p0), %s900_s30, 256, %s889_s28, %s902_s11, %s770_s15, %s770_s15, %s771_s18  }
  0x35   : > { %p513_p2 = scmp.ge.s32.totalorder %s767_s25, 1  ;;  %p224_p4 = scmp.lt.s32.totalorder %s767_s25, 5 }
  0x37   : > { %p225_p10 = pnand %p513_p2, %p224_p4 }
  0x38   : > { %s933_s7 = sand.u32 (!%p225_p10), 1, %s743_s19  }
  0x39   : > { %228 = sbr.rel (%p225_p10) target bundleno = 628 (0x274), region = 40  ;;  %s514_s16 = sshll.u32 (!%p225_p10), %s933_s7, 4 }
  0x3a   : > { %s231_s29 = scalar_lea.sflag (!%p225_p10), [#allocation3], %s933_s7  ;;  %s234_s17 = scalar_lea.vmem (!%p225_p10), [#allocation2], %s514_s16 }
  0x40   : > { %730 = dma.done.wait (%p868_p8), %s231_s29, 256  }
  0x41   : > { %732 = vsyncadd (%p868_p8), %s231_s29, 4294967040  ;;  %v772_v0 = vmov 0.0   ;;  %vm773_vm0 = vmmov 0   ;;  %v631_v1 = vld [vmem:[%s1034_s1] sm:$0xff]   ;;  %v632_v2 = vld [vmem:[%s1034_s1 + $0x8] sm:$0xff]   ;;  %vm306_vm1 = vcmask 1043456  }
  0x42   : > { %535 = vmatprep.subr.bf16.mxu0 %v772_v0  ;;  %543 = vmatprep.mubr.msk.bf16.mxu0 %vm773_vm0, %v772_v0  ;;  %v633_v3 = vld [vmem:[%s1034_s1 + $0x10] sm:$0xff]   ;;  %v634_v4 = vld [vmem:[%s1034_s1 + $0x18] ss:$0 sps:$4 sm:$0xff]   ;;  %vm302_vm2 = vcmask 457728   ;;  %v516_v9 = vld [vmem:[%s1035_s2] ss:$0 sm:$0xff] }
  0x43   : > { %536 = vmatpush3.bf16.msra.mxu0 %v631_v1  ;;  %v264_v5 = vld [vmem:[%s234_s17] sm:$0xff]  ;;  %v265_v6 = vld [vmem:[%s234_s17 + $0x8] sm:$0xff]  ;;  %v308_v7 = vsel %vm306_vm1, %v634_v4, 0  ;;  %vm353_vm3 = vcmask 261120   ;;  %s525_s18 = sshll.u32 %s751_s21, 1  ;;  %s526_s29 = sshll.u32 %s755_s22, 2 }
  0x44   : > { %537 = vmatprep.subr.bf16.mxu0 %v772_v0  ;;  %v266_v8 = vpack.c.bf16 %v265_v6, %v264_v5  ;;  %v522_v35 = vld [vmem:[%s1036_s3] ss:$0 sm:$0xff]  ;;  %s412_s11 = sadd.s32 %s526_s29, %s525_s18  ;;  %s260_s21 = scalar_lea.vmem [#allocation5], %s514_s16 }
  0x45   : > { %v523_v37 = vld [vmem:[%s1037_s4] ss:$0 sm:$0xff]  ;;  %s527_s13 = sshll.u32 %s412_s11, 7  ;;  %s415_s22 = sshll.u32 %s260_s21, 4  ;;  %s978_s22 = int_to_ptr.vmem [resolvable:$true] %s415_s22 }
  0x46   : > { %s976_s6 = scalar_lea.hbm %s1038_s5, %s527_s13  ;;  %s400_s10 = scalar_lea.sflag [#allocation4], %s933_s7 }
  0x47   : > { %538 = vmatpush3.bf16.msra.mxu0 %v632_v2  ;;  %s669_s15 = scalar_lea.vmem %s978_s22, 256  ;;  %p1051_p9 = scmp.ne.s32.totalorder %s1048_s9, 0 }
  0x48   : > { %539 = vmatprep.subr.bf16.mxu0 %v772_v0  ;;  %p670_p8 = scmp.ne.s32.totalorder %s978_s22, %s669_s15  ;;  %s774_s16 = smov [#allocation5]  }
  0x49   : > { %s673_s18 = sshll.u32 %s774_s16, 4  ;;  %s674_s18 = int_to_ptr.vmem [resolvable:$false] %s673_s18 }
  0x4a   : > { %p671_p12 = pnand %p670_p8, %p1051_p9  ;;  %s675_s29 = scalar_lea.vmem %s674_s18, 512 }
  0x4b   : > { %540 = vmatpush3.bf16.msra.mxu0 %v633_v3  ;;  %p676_p11 = scmp.lt.s32.totalorder %s978_s22, %s674_s18  ;;  %p677_p13 = scmp.lt.s32.totalorder %s675_s29, %s669_s15 }
  0x4c   : > { %541 = vmatprep.subr.bf16.mxu0 %v772_v0  ;;  %p672_p0 = pneg %p671_p12 }
  0x4d   : > { %p678_p1 = por %p677_p13, %p676_p11 }
  0x4f   : > { %542 = vmatpush3.bf16.msra.mxu0 %v308_v7  ;;  %p679_p3 = pnand %p678_p1, %p672_p0 }
  0x52   : > { %544 = vmatmul.mubr.msk.bf16.vlgmr.msra.gmra.mrb[0].mxu0 %vm302_vm2, %v266_v8 }
 0x125   : > { %v344_v10 = vpop.f32.mrb[0].mxu0 }
 0x126   : > { %v345_v11 = vadd.f32 %v516_v9, %v344_v10  ;;  %v545_v12 = vpop.f32.mrb[1].mxu0 }
 0x127   : > { %v347_v13 = vpop.f32.mrb[2].mxu0 }
 0x128   : > { %v348_v14 = vadd.f32 %v516_v9, %v347_v13  ;;  %v546_v15 = vpop.f32.mrb[3].mxu0  ;;  %v354_v16 = vsel %vm353_vm3, %v345_v11, 0.0 }
 0x129   : > { %355 = vadd.xlane.f32.xlu0 %v354_v16 }
 0x12a   : > { %v357_v17 = vsel %vm353_vm3, %v348_v14, 0.0 }
 0x12d   : > { %358 = vadd.xlane.f32.xlu0 %v357_v17 }
 0x1b6   : > { %v356_v18 = vpop.xlane.xlu0 %355 }
 0x1b7   : > { %v361_v19 = vmul.f32 0.03125, %v356_v18 }
 0x1b9   : > { %v363_v20 = vsub.f32 %v345_v11, %v361_v19 }
 0x1ba   : > { %v359_v21 = vpop.xlane.xlu0 %358 }
 0x1bb   : > { %v362_v22 = vmul.f32 0.03125, %v359_v21  ;;  %v365_v23 = vmul.f32 %v363_v20, %v363_v20 }
 0x1bd   : > { %v364_v24 = vsub.f32 %v348_v14, %v362_v22  ;;  %v367_v25 = vsel %vm353_vm3, %v365_v23, 0.0 }
 0x1be   : > { %368 = vadd.xlane.f32.xlu1 %v367_v25 }
 0x1bf   : > { %v366_v26 = vmul.f32 %v364_v24, %v364_v24 }
 0x1c1   : > { %v370_v27 = vsel %vm353_vm3, %v366_v26, 0.0 }
 0x1c2   : > { %371 = vadd.xlane.f32.xlu1 %v370_v27 }
 0x24b   : > { %v369_v28 = vpop.xlane.xlu1 %368 }
 0x24c   : > { %v373_v29 = vmul.f32 0.03125, %v369_v28 }
 0x24e   : > { %v375_v30 = vadd.f32 1e-05, %v373_v29 }
 0x24f   : > { %v372_v31 = vpop.xlane.xlu1 %371 }
 0x250   : > { %635 = vrsqrt.f32 %v375_v30  ;;  %v374_v32 = vmul.f32 0.03125, %v372_v31 }
 0x252   : > { %v376_v33 = vadd.f32 1e-05, %v374_v32 }
 0x254   : > { %637 = vrsqrt.f32 %v376_v33 }
 0x25a   : > { %v636_v34 = vpop.eup %635 }
 0x25b   : > { %v379_v36 = vmul.f32 %v636_v34, %v363_v20 }
 0x25d   : > { %v387_v38 = vmul.f32 %v522_v35, %v379_v36 }
 0x25e   : > { %v638_v39 = vpop.eup %637 }
 0x25f   : > { %v395_v40 = vadd.f32 %v523_v37, %v387_v38  ;;  %v380_v41 = vmul.f32 %v638_v39, %v364_v24 }
 0x261   : > { %v388_v42 = vmul.f32 %v522_v35, %v380_v41  ;;  %397 = vst.msk [vmem:[%s260_s21] sm:$0xff] %vm353_vm3, %v395_v40 }
 0x263   : > { %v396_v43 = vadd.f32 %v523_v37, %v388_v42 }
 0x265   : > { %398 = vst.msk [vmem:[%s260_s21 + $0x8] sm:$0xff] %vm353_vm3, %v396_v43 }
 0x266   : > { %682 = shalt.err (!%p679_p3)
}
 0x267   : > { %s683_s17 = scalar_lea.hbm %s976_s6, 256  ;;  %s687_s30 = scalar_lea.hbm %s1038_s5, 1024 }
 0x268   : > { %p684_p5 = scmp.ne.s32.totalorder %s976_s6, %s683_s17  ;;  %p688_p2 = scmp.lt.u32.totalorder %s976_s6, %s1038_s5 }
 0x269   : > { %p689_p4 = scmp.lt.u32.totalorder %s687_s30, %s683_s17  ;;  %p691_p8 = scmp.lt.u32.totalorder %s683_s17, %s976_s6 }
 0x26a   : > { %p685_p6 = pnand %p684_p5, %p1051_p9 }
 0x26b   : > { %p690_p10 = por %p689_p4, %p688_p2 }
 0x26c   : > { %p686_p7 = pneg %p685_p6 }
 0x26d   : > { %p692_p12 = por %p691_p8, %p690_p10 }
 0x26f   : > { %p693_p0 = pnand %p692_p12, %p686_p7 }
 0x271   : > { %696 = shalt.err (!%p693_p0)
}
 0x272   : > { %s775_s21 = smov 128   ;;  %s776_s26 = smov 8  }
 0x273   : > { %549 = dma.vmem_to_hbm [thread:$0]  (%p1051_p9), %s978_s22, 256, %s976_s6, %s400_s10, %s775_s21, %s775_s21, %s776_s26  }
 0x274 PF: > { %s1052_s8 = sld [smem:[#allocation8_spill]]  ;;  %p560_p11 = scmp.ge.s32.totalorder %s767_s25, 2 }
 0x275   : > { %p1053_p13 = scmp.ne.s32.totalorder %s1049_s12, 0 }
 0x277   : > { %p556_p1 = pnand %p560_p11, %p1053_p13 }
 0x27a   : > { %s430_s15 = sand.u32 1, %s1052_s8  }
 0x27b   : > { %s431_s16 = scalar_lea.sflag [#allocation4], %s430_s15 }
 0x27c   : > { %734 = dma.done.wait (!%p556_p1), %s431_s16, 256  }
 0x27d   : > { %736 = vsyncadd (!%p556_p1), %s431_s16, 4294967040  ;;  %s21_s25 = sadd.s32 1, %s767_s25   ;;  %s1054_s9 = sld [smem:[#allocation9_spill]] }
 0x27e   : > { %p18_p3 = scmp.ge.s32.totalorder %s21_s25, 6   ;;  %s1055_s7 = sld [smem:[#allocation10_spill]] }
 0x27f   : > { %s1056_s18 = smov %s743_s19  ;;  %s1057_s19 = smov %s747_s20 }
 0x280   : > { %s1058_s20 = smov %s885_s14  ;;  %s1059_s21 = smov %s759_s23 }
 0x281   : > { %s1060_s22 = smov %s763_s24  ;;  %20 = sbr.rel (!%p18_p3) target bundleno = 7 (0x7), region = 85 }
 0x283   : > { %s1061_s23 = smov %s1054_s9 }
 0x284   : > { %s1062_s24 = smov %s1055_s7 }
 0x288   :  { %436 = vsyncpa [#allocation3], 1 }
 0x289   :  { %438 = vsyncpa [#allocation3 + $0x1], 1 }
 0x28a   :  { %439 = vsyncpa [#allocation4], 1 }
 0x28b   :  { %441 = vsyncpa [#allocation4 + $0x1], 1 }

</bundles_post_ra>
